<compile_context>
chip_gen: v7x
topology: tpu7x:2x2x1
jax: 0.10.0
libtpu: 0.0.40
codegen_flags: <defaults>
</compile_context>

<pallas_src>
import jax
import jax.numpy as jnp
from jax.experimental import pallas as pl
from jax.experimental.pallas import tpu as pltpu


# ---------------------------------------------------------------------------
# Hardware-aware sizing helpers
# ---------------------------------------------------------------------------
def _tpu_budget():
    """Return (physical_vmem_bytes, tensorcores_per_chip), conservative fallbacks."""
    phys_vmem = 64 * 1024 * 1024          # smallest across v5e/v6e/v7x
    num_cores = 1                         # v5e / v6e have a single TensorCore
    try:
        info = pltpu.get_tpu_info()
        for name in ("vmem_capacity_bytes", "vmem_bytes", "vmem_size_bytes"):
            v = getattr(info, name, None)
            if v:
                phys_vmem = int(v)
                break
        for name in ("num_cores", "core_count", "num_tensorcores",
                     "tensorcores_per_chip"):
            v = getattr(info, name, None)
            if v:
                num_cores = int(v)
                break
    except Exception:
        pass
    try:
        kind = jax.devices()[0].device_kind.lower()
        if "v7" in kind or "7x" in kind:
            num_cores = max(num_cores, 2)
            phys_vmem = min(phys_vmem, 64 * 1024 * 1024)
    except Exception:
        pass
    return phys_vmem, num_cores


def _vmem_limit(block_bytes, phys_vmem):
    """Explicit scoped-VMEM budget: 2x in block + 2x out block + weights/scratch slack."""
    limit = 4 * block_bytes + (2 << 20)
    limit = max(limit, 16 << 20)
    limit = min(limit, max(phys_vmem - (8 << 20), 16 << 20))
    return int(limit)


def _pool_sum_f32(x, chunk=2048):
    """Sum over the last axis, accumulating in f32, without materializing a full
    f32 upcast of a sub-32-bit tile (chunks the lane axis instead)."""
    if x.dtype == jnp.float32 or x.shape[-1] <= chunk:
        return jnp.sum(x, axis=-1, dtype=jnp.float32)
    hw = x.shape[-1]
    acc = jnp.zeros(x.shape[:-1], jnp.float32)
    for s in range(0, hw, chunk):
        acc = acc + jnp.sum(x[..., s:min(s + chunk, hw)], axis=-1,
                            dtype=jnp.float32)
    return acc


# ---------------------------------------------------------------------------
# Fused single-pass kernel (2N HBM traffic): pool + FC + sigmoid + scale
# ---------------------------------------------------------------------------
def _se_fused_kernel(x_ref, w1t_ref, w2t_ref, o_ref):
    # x_ref:  (B_TILE, C, HW)   native dtype (full C/HW dims -> (8,128) exempt)
    # w1t_ref:(C, hidden)       f32, 1/HW already folded in
    # w2t_ref:(hidden, C)       f32
    x = x_ref[...]

    # Squeeze: global sum pool over the spatial (lane) axis, f32 accumulation.
    pooled = _pool_sum_f32(x)                                        # (B_TILE, C)

    # Excitation: tiny batched FC -> ReLU -> FC -> sigmoid (off the DMA path).
    h = jnp.maximum(
        jnp.dot(pooled, w1t_ref[...], preferred_element_type=jnp.float32), 0.0)
    att = jax.nn.sigmoid(
        jnp.dot(h, w2t_ref[...], preferred_element_type=jnp.float32))  # (B_TILE, C)

    # Scale: broadcast per-channel attention over the spatial axis, native dtype.
    o_ref[...] = (x * att[:, :, None].astype(x.dtype)).astype(o_ref.dtype)


# ---------------------------------------------------------------------------
# Two-pass fallback (3N HBM traffic) for feature maps too large to fit a
# double-buffered (C, HW) slab in VMEM.
# ---------------------------------------------------------------------------
def _make_pool_kernel(hw_total, hw_tile):
    def pool_kernel(x_ref, pooled_ref, acc_ref):
        hwi = pl.program_id(1)

        @pl.when(hwi == 0)
        def _init():
            acc_ref[...] = jnp.zeros_like(acc_ref)

        x = x_ref[...]                                          # (bt, C, hw_tile)
        col = jax.lax.broadcasted_iota(jnp.int32, x.shape, x.ndim - 1)
        valid = (hwi * hw_tile + col) < hw_total                # mask ragged tail
        xm = jnp.where(valid, x, jnp.zeros_like(x))
        acc_ref[...] += _pool_sum_f32(xm)[..., None]            # (bt, C, 1) f32

        @pl.when(hwi == pl.num_programs(1) - 1)
        def _store():
            pooled_ref[...] = acc_ref[...]
    return pool_kernel


def _scale_kernel(x_ref, att_ref, o_ref):
    # x_ref: (bt, C, hw_tile) native dtype; att_ref: (bt, C, 1) f32
    x = x_ref[...]
    o_ref[...] = (x * att_ref[...].astype(x.dtype)).astype(o_ref.dtype)


def _channel_attention_two_pass(x3, w1t, w2t, *, hw_tile, vmem_limit):
    """Pool kernel -> tiny FC in plain JAX -> streaming scale kernel."""
    B, C, HW = x3.shape
    b_tile = 1
    grid = (pl.cdiv(B, b_tile), pl.cdiv(HW, hw_tile))

    pooled = pl.pallas_call(
        _make_pool_kernel(HW, hw_tile),
        out_shape=jax.ShapeDtypeStruct((B, C, 1), jnp.float32),
        grid_spec=pltpu.PrefetchScalarGridSpec(
            num_scalar_prefetch=0,
            grid=grid,
            in_specs=[pl.BlockSpec((b_tile, C, hw_tile), lambda b, h: (b, 0, h))],
            out_specs=pl.BlockSpec((b_tile, C, 1), lambda b, h: (b, 0, 0)),
            scratch_shapes=[pltpu.VMEM((b_tile, C, 1), jnp.float32)]),
        compiler_params=pltpu.CompilerParams(
            dimension_semantics=("parallel", "arbitrary"),
            vmem_limit_bytes=vmem_limit),
    )(x3)

    # Excitation on (B, C): negligible FLOPs, leave to XLA.
    p = pooled[:, :, 0]
    h = jnp.maximum(p @ w1t, 0.0)
    att = jax.nn.sigmoid(h @ w2t)[:, :, None]                   # (B, C, 1) f32

    out = pl.pallas_call(
        _scale_kernel,
        out_shape=jax.ShapeDtypeStruct((B, C, HW), x3.dtype),
        grid_spec=pltpu.PrefetchScalarGridSpec(
            num_scalar_prefetch=0,
            grid=grid,
            in_specs=[pl.BlockSpec((b_tile, C, hw_tile), lambda b, h: (b, 0, h)),
                      pl.BlockSpec((b_tile, C, 1), lambda b, h: (b, 0, 0))],
            out_specs=pl.BlockSpec((b_tile, C, hw_tile), lambda b, h: (b, 0, h)),
        ),
        compiler_params=pltpu.CompilerParams(
            dimension_semantics=("parallel", "parallel"),
            vmem_limit_bytes=vmem_limit),
        input_output_aliases={0: 0},
    )(x3, att)
    return out


# ---------------------------------------------------------------------------
# Public wrapper
# ---------------------------------------------------------------------------
def channel_attention(x, w1, w2):
    """SE channel attention.  x: (B, C, H, W); w1: (hidden, C); w2: (C, hidden)."""
    B, C, H, W = x.shape
    HW = H * W
    hidden = w1.shape[0]
    assert w1.shape == (hidden, C) and w2.shape == (C, hidden)

    # (B, C, HW): lane axis = spatial.  No pad / slice; the tail masked store
    # is cheaper than two extra full-tensor HBM passes, and the alias below
    # then points at x's real buffer.
    x3 = x.reshape(B, C, HW)

    # Fold 1/HW of the mean into w1 and pre-transpose both weights so the
    # kernel's excitation is lane-dense right-multiplies.
    w1t = (w1.astype(jnp.float32) * (1.0 / HW)).T               # (C, hidden)
    w2t = w2.astype(jnp.float32).T                              # (hidden, C)

    phys_vmem, num_cores = _tpu_budget()
    footprint_budget = min(phys_vmem // 2, 48 << 20)   # 2 in + 2 out blocks
    block_bytes_cap = footprint_budget // 4
    target_block_bytes = min(4 << 20, block_bytes_cap)

    itemsize = jnp.dtype(x.dtype).itemsize
    bytes_per_batch = C * HW * itemsize

    if bytes_per_batch > block_bytes_cap:
        # A single (C, HW) slab no longer fits double-buffered: two-pass fallback.
        hw_tile = max(128, (target_block_bytes // (C * itemsize)) // 128 * 128)
        hw_tile = int(min(hw_tile, HW))
        block_bytes = C * hw_tile * itemsize
        out = _channel_attention_two_pass(
            x3, w1t, w2t, hw_tile=hw_tile,
            vmem_limit=_vmem_limit(block_bytes, phys_vmem))
        return out.reshape(B, C, H, W)

    # --- fused single-pass path: minimal 2N HBM traffic ---
    b_tile = max(1, int(target_block_bytes // bytes_per_batch))
    if num_cores >= 2:
        # v7x megacore: keep >=4 grid steps per TensorCore so each core still
        # double-buffers; fall back to >=1 step/core for tiny batches.
        min_steps = 4 * num_cores
        if B >= min_steps:
            b_tile = min(b_tile, pl.cdiv(B, min_steps))
        elif B >= num_cores:
            b_tile = min(b_tile, pl.cdiv(B, num_cores))
    b_tile = int(min(b_tile, B))
    grid = (pl.cdiv(B, b_tile),)    # ragged last block OK: batch rows independent

    block_bytes = b_tile * bytes_per_batch
    vmem_limit = _vmem_limit(block_bytes, phys_vmem)

    out = pl.pallas_call(
        _se_fused_kernel,
        out_shape=jax.ShapeDtypeStruct((B, C, HW), x.dtype),
        grid_spec=pltpu.PrefetchScalarGridSpec(
            num_scalar_prefetch=0,
            grid=grid,
            in_specs=[
                pl.BlockSpec((b_tile, C, HW), lambda b: (b, 0, 0)),
                pl.BlockSpec((C, hidden), lambda b: (0, 0)),
                pl.BlockSpec((hidden, C), lambda b: (0, 0)),
            ],
            out_specs=pl.BlockSpec((b_tile, C, HW), lambda b: (b, 0, 0)),
        ),
        compiler_params=pltpu.CompilerParams(
            dimension_semantics=("parallel",),
            vmem_limit_bytes=vmem_limit),
        # Logically an in-place per-channel scale: reuse x3's HBM buffer when
        # XLA can alias it (otherwise a defensive copy is inserted; harmless).
        input_output_aliases={0: 0},
    )(x3, w1t, w2t)

    return out.reshape(B, C, H, W)


def channel_attention_reference(x, w1, w2):
    pooled = jnp.mean(x.astype(jnp.float32), axis=(2, 3))        # (B, C)
    h = jnp.maximum(pooled @ w1.astype(jnp.float32).T, 0.0)      # (B, hidden)
    att = jax.nn.sigmoid(h @ w2.astype(jnp.float32).T)           # (B, C)
    return (x * att[:, :, None, None].astype(x.dtype)).astype(x.dtype)


if __name__ == "__main__":
    # Small shapes consistent with the module: in_ch=32, ratio=4 -> hidden=8.
    B, C, H, W = 2, 32, 16, 16
    ratio = 4
    hidden = C // ratio

    key = jax.random.PRNGKey(0)
    kx, k1, k2 = jax.random.split(key, 3)

    x = jax.random.normal(kx, (B, C, H, W), dtype=jnp.float32)
    # Deterministic Kaiming-style init for the two bias-free Linear layers.
    w1 = jax.random.normal(k1, (hidden, C), dtype=jnp.float32) * (2.0 / C) ** 0.5
    w2 = jax.random.normal(k2, (C, hidden), dtype=jnp.float32) * (2.0 / hidden) ** 0.5

    ref = channel_attention_reference(x, w1, w2)

    # Fused single-pass path (the one selected for these shapes).
    out = jax.block_until_ready(channel_attention(x, w1, w2))
    assert out.shape == (B, C, H, W)
    assert jnp.allclose(out, ref, atol=1e-5, rtol=1e-5), "fused path mismatch"

    # Also exercise the two-pass fallback (normally used for huge feature maps)
    # at a small shape by forcing a 128-wide spatial tile.
    HW = H * W
    x3 = x.reshape(B, C, HW)
    w1t = (w1.astype(jnp.float32) * (1.0 / HW)).T
    w2t = w2.astype(jnp.float32).T
    out2 = _channel_attention_two_pass(x3, w1t, w2t, hw_tile=128,
                                       vmem_limit=32 << 20)
    out2 = jax.block_until_ready(out2).reshape(B, C, H, W)
    assert jnp.allclose(out2, ref, atol=1e-5, rtol=1e-5), "two-pass path mismatch"

    print("KERNEL_OK")
</pallas_src>

<mosaic_0001>
module attributes {stable_mosaic.version = 11 : i64} {
  func.func @_se_fused_kernel(%arg0: i32, %arg1: memref<2x32x256xf32, #tpu.memory_space<vmem>>, %arg2: memref<32x8xf32, #tpu.memory_space<vmem>>, %arg3: memref<8x32xf32, #tpu.memory_space<vmem>>, %arg4: memref<2x32x256xf32, #tpu.memory_space<vmem>>) attributes {dimension_semantics = [#tpu.dimension_semantics<parallel>], iteration_bounds = array<i64: 1>, scalar_prefetch = 0 : i64, scratch_operands = 0 : i64, tpu.core_type = #tpu.core_type<tc>, window_params = [{transform_indices = @transform_0, window_bounds = array<i64: 2, 32, 256>}, {pipeline_mode = #tpu.pipeline_mode<synchronous>, transform_indices = @transform_1, window_bounds = array<i64: 32, 8>}, {pipeline_mode = #tpu.pipeline_mode<synchronous>, transform_indices = @transform_2, window_bounds = array<i64: 8, 32>}, {transform_indices = @transform_3, window_bounds = array<i64: 2, 32, 256>}]} {
    %c0 = arith.constant 0 : index
    %c0_0 = arith.constant 0 : index
    %c0_1 = arith.constant 0 : index
    %0 = vector.load %arg1[%c0, %c0_0, %c0_1] : memref<2x32x256xf32, #tpu.memory_space<vmem>>, vector<2x32x256xf32>
    %cst = arith.constant dense<0.000000e+00> : vector<2x32xf32>
    %1 = vector.multi_reduction <add>, %0, %cst [2] : vector<2x32x256xf32> to vector<2x32xf32>
    %c0_2 = arith.constant 0 : index
    %c0_3 = arith.constant 0 : index
    %2 = vector.load %arg2[%c0_2, %c0_3] : memref<32x8xf32, #tpu.memory_space<vmem>>, vector<32x8xf32>
    %cst_4 = arith.constant dense<0.000000e+00> : vector<2x8xf32>
    %3 = tpu.matmul %1, %2, %cst_4 {dimension_numbers = #tpu.dot_dimension_numbers<[1], [0], [0], [1], [0, 0, 1, 1], [], []>} : vector<2x32xf32>, vector<32x8xf32>, vector<2x8xf32> -> vector<2x8xf32>
    %cst_5 = arith.constant 0.000000e+00 : f32
    %4 = vector.broadcast %cst_5 : f32 to vector<2x8xf32>
    %5 = arith.maximumf %3, %4 : vector<2x8xf32>
    %c0_6 = arith.constant 0 : index
    %c0_7 = arith.constant 0 : index
    %6 = vector.load %arg3[%c0_6, %c0_7] : memref<8x32xf32, #tpu.memory_space<vmem>>, vector<8x32xf32>
    %cst_8 = arith.constant dense<0.000000e+00> : vector<2x32xf32>
    %7 = tpu.matmul %5, %6, %cst_8 {dimension_numbers = #tpu.dot_dimension_numbers<[1], [0], [0], [1], [0, 0, 1, 1], [], []>} : vector<2x8xf32>, vector<8x32xf32>, vector<2x32xf32> -> vector<2x32xf32>
    %8 = arith.negf %7 : vector<2x32xf32>
    %9 = math.exp %8 : vector<2x32xf32>
    %cst_9 = arith.constant 1.000000e+00 : f32
    %10 = vector.broadcast %cst_9 : f32 to vector<2x32xf32>
    %11 = arith.addf %10, %9 : vector<2x32xf32>
    %12 = arith.divf %10, %11 : vector<2x32xf32>
    %13 = vector.shape_cast %12 : vector<2x32xf32> to vector<2x32x1xf32>
    %14 = vector.broadcast %13 : vector<2x32x1xf32> to vector<2x32x256xf32>
    %15 = arith.mulf %0, %14 : vector<2x32x256xf32>
    %c0_10 = arith.constant 0 : index
    %c0_11 = arith.constant 0 : index
    %c0_12 = arith.constant 0 : index
    %16 = vector.load %arg4[%c0_10, %c0_11, %c0_12] : memref<2x32x256xf32, #tpu.memory_space<vmem>>, vector<2x32x256xf32>
    tpu.vector_store %arg4[%c0_10, %c0_11, %c0_12], %15 {strides = array<i32>} : memref<2x32x256xf32, #tpu.memory_space<vmem>>, vector<2x32x256xf32>,
    return
  }
  func.func @transform_0(%arg0: i32) -> (i32, i32, i32) {
    %c0_i32 = arith.constant 0 : i32
    %c0_i32_0 = arith.constant 0 : i32
    %c0_i32_1 = arith.constant 0 : i32
    return %arg0, %c0_i32, %c0_i32_0 : i32, i32, i32
  }
  func.func @transform_1(%arg0: i32) -> (i32, i32) {
    %c0_i32 = arith.constant 0 : i32
    %c0_i32_0 = arith.constant 0 : i32
    %c0_i32_1 = arith.constant 0 : i32
    return %c0_i32, %c0_i32_0 : i32, i32
  }
  func.func @transform_2(%arg0: i32) -> (i32, i32) {
    %c0_i32 = arith.constant 0 : i32
    %c0_i32_0 = arith.constant 0 : i32
    %c0_i32_1 = arith.constant 0 : i32
    return %c0_i32, %c0_i32_0 : i32, i32
  }
  func.func @transform_3(%arg0: i32) -> (i32, i32, i32) {
    %c0_i32 = arith.constant 0 : i32
    %c0_i32_0 = arith.constant 0 : i32
    %c0_i32_1 = arith.constant 0 : i32
    return %arg0, %c0_i32, %c0_i32_0 : i32, i32, i32
  }
}

</mosaic_0001>

<bundles_post_ra>
// kernel: tpu_custom_call.1
= control target key start
LH: loop header
LB: loop body
LE: loop exit
PB: predicated region body
PF: predicated region fallthrough
CT: control target
= control target key end

     0   :  { %8 = vsyncpa [#allocation3], 0  ;;  %s598_s0 = inlined_call_operand.hbm [shape: f32[2,32,256], index: 0, kind: input, shape index: {}, may-alias: {0,3}]   ;;  %s599_s1 = inlined_call_operand.vmem [shape: f32[32,8], index: 1, kind: input, shape index: {}]   ;;  %s600_s2 = inlined_call_operand.vmem [shape: f32[8,32], index: 2, kind: input, shape index: {}]   ;;  %s601_s3 = inlined_call_operand.hbm [shape: f32[2,32,256], index: 3, kind: output, shape index: {}, may-alias: {0,3}]  }
   0x1   :  { %9 = vsyncpa [#allocation4], 0  ;;  %s462_s12 = smov [#allocation2]   ;;  %s414_s16 = scalar_lea.hbm %s598_s0, 2048 }
   0x2   :  { %s15_s13 = sshll.u32 %s462_s12, 4  ;;  %p415_p0 = scmp.ne.s32.totalorder %s598_s0, %s414_s16  ;;  %s16_s13 = int_to_ptr.vmem [resolvable:$true] %s15_s13 }
   0x3   :  { %p418_p1 = scmp.lt.u32.totalorder %s414_s16, %s598_s0 }
   0x5   :  { %p420_p2 = pnand %p418_p1, %p415_p0 }
   0x7   :  { %423 = shalt.err (!%p420_p2)
}
   0x8   :  { %s424_s21 = scalar_lea.vmem %s16_s13, 2048  ;;  %p429_p4 = scmp.lt.s32.totalorder %s16_s13, %s16_s13 }
   0x9   :  { %p425_p3 = scmp.ne.s32.totalorder %s16_s13, %s424_s21  ;;  %p430_p5 = scmp.lt.s32.totalorder %s424_s21, %s424_s21 }
   0xb   :  { %p431_p6 = por %p430_p5, %p429_p4 }
   0xd   :  { %p432_p7 = pnand %p431_p6, %p425_p3 }
   0xf   :  { %435 = shalt.err (!%p432_p7)
}
  0x10   :  { %s463_s22 = smov 256   ;;  %s464_s23 = smov 16  }
  0x11   :  { %21 = dma.hbm_to_vmem [thread:$0]  %s598_s0, 2048, %s16_s13, [#allocation3], %s463_s22, %s463_s22, %s464_s23  }
  0x12   :  { %458 = dma.done.wait [#allocation3], 2048  }
  0x13   :  { %459 = vsyncadd [#allocation3], 4294965248  ;;  %v504_v0 = vld [vmem:[#allocation2 + $0x40] sm:$0xff]  ;;  %v506_v1 = vld [vmem:[#allocation2 + $0x48] sm:$0xff]  ;;  %v465_v27 = vmov 0.0|0.0   ;;  %vm466_vm0 = vmmov 0   ;;  %v81_v32 = vlaneseq }
  0x14   :  { %v508_v2 = vld [vmem:[#allocation2] sm:$0xff]  ;;  %v57_v3 = vadd.f32 %v506_v1, %v504_v0  ;;  %v512_v4 = vld [vmem:[#allocation2 + $0x8] sm:$0xff]  ;;  %v514_v5 = vld [vmem:[#allocation2 + $0x50] sm:$0xff]  ;;  %397 = vmatprep.subr.bf16.mxu0 %v465_v27  ;;  %v467_v31 = vmov 0.0   ;;  %vm92_vm1 = vcmask 130112   ;;  %vm99_vm2 = vcmask 195712  }
  0x15   :  { %v516_v6 = vld [vmem:[#allocation2 + $0x58] sm:$0xff]  ;;  %v45_v7 = vadd.f32 %v512_v4, %v508_v2  ;;  %v520_v8 = vld [vmem:[#allocation2 + $0x10] sm:$0xff]  ;;  %v528_v12 = vld [vmem:[#allocation2 + $0x60] sm:$0xff]  ;;  %389 = vmatprep.mubr.msk.f32.mxu0 %vm466_vm0, %v467_v31  ;;  %392 = vmatprep.subr.mxu1 %v467_v31  ;;  %v82_v33 = vand.u32 127, %v81_v32  ;;  %v84_v38 = vshrl.u32 %v81_v32, 7  ;;  %vm106_vm3 = vcmask 261312  }
  0x16   :  { %v522_v9 = vld [vmem:[#allocation2 + $0x18] sm:$0xff]  ;;  %58 = vadd.xlane.f32.xlu1 %v57_v3  ;;  %v60_v10 = vadd.f32 %v516_v6, %v514_v5  ;;  %v530_v13 = vld [vmem:[#allocation2 + $0x68] sm:$0xff]  ;;  %v532_v14 = vld [vmem:[#allocation2 + $0x20] sm:$0xff]  ;;  %394 = vmatprep.mubr.msk.f32.mxu1 %vm466_vm0, %v467_v31  ;;  %vm127_vm4 = vcmask 1041409   ;;  %vm129_vm5 = vcmask 261120   ;;  %vm204_vm6 = vcmask 64512  }
  0x17   :  { %46 = vadd.xlane.f32.xlu0 %v45_v7  ;;  %v48_v11 = vadd.f32 %v522_v9, %v520_v8  ;;  %v534_v15 = vld [vmem:[#allocation2 + $0x28] sm:$0xff]  ;;  %v63_v16 = vadd.f32 %v530_v13, %v528_v12  ;;  %v540_v18 = vld [vmem:[#allocation2 + $0x70] sm:$0xff]  ;;  %v542_v19 = vld [vmem:[#allocation2 + $0x78] sm:$0xff]  ;;  %v87_v36 = vadd.s32 4294967288, %v82_v33  ;;  %v94_v37 = vadd.s32 4294967280, %v82_v33 }
  0x18   :  { %v51_v17 = vadd.f32 %v534_v15, %v532_v14  ;;  %v544_v20 = vld [vmem:[#allocation2 + $0x30] sm:$0xff]  ;;  %v546_v21 = vld [vmem:[#allocation2 + $0x38] sm:$0xff]  ;;  %v66_v22 = vadd.f32 %v542_v19, %v540_v18  ;;  %v69_v24 = vld [vmem:[%s599_s1] sm:$0xff]  ;;  %v101_v42 = vadd.s32 4294967272, %v82_v33  ;;  %v85_v44 = vsub.s32 %v82_v33, %v84_v38 }
  0x19   :  { %v54_v23 = vadd.f32 %v546_v21, %v544_v20  ;;  %v70_v25 = vld [vmem:[%s599_s1 + $0x8] sm:$0xff]  ;;  %v71_v28 = vld [vmem:[%s599_s1 + $0x10] sm:$0xff]  ;;  %v72_v29 = vld [vmem:[%s599_s1 + $0x18] sm:$0xff]  ;;  %v90_v40 = vsub.s32 %v87_v36, %v84_v38  ;;  %v97_v43 = vsub.s32 %v94_v37, %v84_v38 }
  0x1a   :  { %61 = vadd.xlane.f32.xlu1 %v60_v10  ;;  %v398_v26 = vpack.c.bf16 %v70_v25, %v69_v24  ;;  %v401_v30 = vpack.c.bf16 %v72_v29, %v71_v28  ;;  %v104_v48 = vsub.s32 %v101_v42, %v84_v38  ;;  %v203_v7 = vld [vmem:[%s600_s2] sm:$0xff]  ;;  %v305_v29 = vsub.s32 1, %v84_v38  ;;  %s468_s2 = smov [#allocation5]  }
  0x1b   :  { %49 = vadd.xlane.f32.xlu0 %v48_v11  ;;  %393 = vmatpush3.msra.mxu1 %v203_v7  ;;  %s359_s7 = sshll.u32 %s468_s2, 4  ;;  %s360_s7 = int_to_ptr.vmem [resolvable:$true] %s359_s7 }
  0x1c   :  { %399 = vmatpush3.bf16.msra.mxu0 %v398_v26  ;;  %v286_v26 = vsub.s32 0, %v84_v38  ;;  %s436_s8 = scalar_lea.vmem %s360_s7, 2048  ;;  %p441_p9 = scmp.lt.s32.totalorder %s360_s7, %s360_s7 }
  0x1d   :  { %400 = vmatprep.subr.bf16.mxu0 %v465_v27  ;;  %p437_p8 = scmp.ne.s32.totalorder %s360_s7, %s436_s8  ;;  %p442_p10 = scmp.lt.s32.totalorder %s436_s8, %s436_s8 }
  0x1e   :  { %64 = vadd.xlane.f32.xlu1 %v63_v16 }
  0x1f   :  { %52 = vadd.xlane.f32.xlu0 %v51_v17  ;;  %p443_p11 = por %p442_p10, %p441_p9 }
  0x20   :  { %402 = vmatpush3.bf16.msra.mxu0 %v401_v30 }
  0x21   :  { %p444_p12 = pnand %p443_p11, %p437_p8 }
  0x22   :  { %67 = vadd.xlane.f32.xlu1 %v66_v22 }
  0x23   :  { %55 = vadd.xlane.f32.xlu0 %v54_v23 }
  0xa3   :  { %v59_v34 = vpop.xlane.xlu1 %58 }
  0xa4   :  { %v47_v35 = vpop.xlane.xlu0 %46  ;;  %v111_v51 = vrot.slane %v59_v34, %v85_v44 }
  0xa5   :  { %v86_v53 = vrot.slane %v47_v35, %v85_v44 }
  0xa7   :  { %v62_v39 = vpop.xlane.xlu1 %61 }
  0xa8   :  { %v50_v41 = vpop.xlane.xlu0 %49  ;;  %v115_v46 = vrot.slane %v62_v39, %v90_v40 }
  0xa9   :  { %v91_v49 = vrot.slane %v50_v41, %v90_v40 }
  0xaa   :  { %v116_v55 = vsel %vm92_vm1, %v115_v46, %v111_v51 }
  0xab   :  { %v65_v45 = vpop.xlane.xlu1 %64  ;;  %v93_v58 = vsel %vm92_vm1, %v91_v49, %v86_v53 }
  0xac   :  { %v53_v47 = vpop.xlane.xlu0 %52  ;;  %v120_v50 = vrot.slane %v65_v45, %v97_v43 }
  0xad   :  { %v98_v52 = vrot.slane %v53_v47, %v97_v43 }
  0xae   :  { %v121_v59 = vsel %vm99_vm2, %v120_v50, %v116_v55 }
  0xaf   :  { %v68_v54 = vpop.xlane.xlu1 %67  ;;  %v100_v61 = vsel %vm99_vm2, %v98_v52, %v93_v58 }
  0xb0   :  { %v125_v56 = vrot.slane %v68_v54, %v104_v48  ;;  %v56_v57 = vpop.xlane.xlu0 %55 }
  0xb1   :  { %v105_v60 = vrot.slane %v56_v57, %v104_v48 }
  0xb2   :  { %v126_v62 = vsel %vm106_vm3, %v125_v56, %v121_v59 }
  0xb3   :  { %v107_v63 = vsel %vm106_vm3, %v105_v60, %v100_v61 }
  0xb4   :  { %v128_v3 = vsel %vm127_vm4, %v126_v62, %v107_v63 }
  0xb5   :  { %390 = vmatmul.mubr.msk.f32.vlgmr.msra.gmra.mrb[0].mxu0 %vm129_vm5, %v128_v3 }
 0x188   :  { %v198_v10 = vpop.f32.mrb[0].mxu0 }
 0x189   :  { %v202_v11 = vmax.f32 %v198_v10, 0.0  ;;  %v391_v16 = vpop.f32.mrb[1].mxu0 }
 0x18b   :  { %395 = vmatmul.mubr.msk.f32.vlgmr.msra.gmra.mrb[0].mxu1 %vm204_vm6, %v202_v11 }
 0x25e   :  { %v274_v17 = vpop.f32.mrb[0].mxu1 }
 0x25f   :  { %v373_v22 = vmul.f32 -1.442695, %v274_v17  ;;  %v396_v23 = vpop.f32.mrb[1].mxu1 }
 0x261   :  { %410 = vpow2.f32 %v373_v22 }
 0x26b   :  { %v411_v24 = vpop.eup %410 }
 0x26c   :  { %v281_v25 = vadd.f32 1.0, %v411_v24 }
 0x26e   :  { %412 = vrcp.f32 %v281_v25 }
 0x278   :  { %v413_v27 = vpop.eup %412 }
 0x279   :  { %v287_v28 = vrot.slane %v413_v27, %v286_v26  ;;  %v306_v30 = vrot.slane %v413_v27, %v305_v29 }
 0x27b   :  { %293 = vbcast.lane.b32.xlu1 %v287_v28, 264  ;;  %289 = vbcast.lane.b32.xlu0 %v287_v28, 256 }
 0x27f   :  { %297 = vbcast.lane.b32.xlu1 %v287_v28, 272  ;;  %308 = vbcast.lane.b32.xlu0 %v306_v30, 256 }
 0x283   :  { %301 = vbcast.lane.b32.xlu1 %v287_v28, 280  ;;  %316 = vbcast.lane.b32.xlu0 %v306_v30, 272 }
 0x287   :  { %312 = vbcast.lane.b32.xlu1 %v306_v30, 264 }
 0x28b   :  { %320 = vbcast.lane.b32.xlu1 %v306_v30, 280 }
 0x2ed   :  { %v294_v31 = vpop.permute.xlu1 %293  ;;  %v290_v32 = vpop.permute.xlu0 %289 }
 0x2ee   :  { %v324_v33 = vmul.f32 %v294_v31, %v520_v8  ;;  %v325_v34 = vmul.f32 %v294_v31, %v522_v9  ;;  %v322_v35 = vmul.f32 %v290_v32, %v508_v2  ;;  %v323_v36 = vmul.f32 %v290_v32, %v512_v4 }
 0x2f0   :  { %340 = vst [vmem:[#allocation5 + $0x10] sm:$0xff] %v324_v33  ;;  %341 = vst [vmem:[#allocation5 + $0x18] sm:$0xff] %v325_v34 }
 0x2f1   :  { %338 = vst [vmem:[#allocation5] sm:$0xff] %v322_v35  ;;  %339 = vst [vmem:[#allocation5 + $0x8] sm:$0xff] %v323_v36  ;;  %v298_v37 = vpop.permute.xlu1 %297  ;;  %v309_v38 = vpop.permute.xlu0 %308 }
 0x2f2   :  { %v326_v39 = vmul.f32 %v298_v37, %v532_v14  ;;  %v327_v40 = vmul.f32 %v298_v37, %v534_v15  ;;  %v330_v41 = vmul.f32 %v309_v38, %v504_v0  ;;  %v331_v8 = vmul.f32 %v309_v38, %v506_v1 }
 0x2f4   :  { %342 = vst [vmem:[#allocation5 + $0x20] sm:$0xff] %v326_v39  ;;  %343 = vst [vmem:[#allocation5 + $0x28] sm:$0xff] %v327_v40 }
 0x2f5   :  { %346 = vst [vmem:[#allocation5 + $0x40] sm:$0xff] %v330_v41  ;;  %347 = vst [vmem:[#allocation5 + $0x48] sm:$0xff] %v331_v8  ;;  %v302_v2 = vpop.permute.xlu1 %301  ;;  %v317_v4 = vpop.permute.xlu0 %316 }
 0x2f6   :  { %v328_v9 = vmul.f32 %v302_v2, %v544_v20  ;;  %v329_v42 = vmul.f32 %v302_v2, %v546_v21  ;;  %v334_v43 = vmul.f32 %v317_v4, %v528_v12  ;;  %v335_v14 = vmul.f32 %v317_v4, %v530_v13 }
 0x2f8   :  { %344 = vst [vmem:[#allocation5 + $0x30] sm:$0xff] %v328_v9  ;;  %345 = vst [vmem:[#allocation5 + $0x38] sm:$0xff] %v329_v42 }
 0x2f9   :  { %350 = vst [vmem:[#allocation5 + $0x60] sm:$0xff] %v334_v43  ;;  %351 = vst [vmem:[#allocation5 + $0x68] sm:$0xff] %v335_v14  ;;  %v313_v0 = vpop.permute.xlu1 %312 }
 0x2fa   :  { %v332_v1 = vmul.f32 %v313_v0, %v514_v5  ;;  %v333_v15 = vmul.f32 %v313_v0, %v516_v6 }
 0x2fc   :  { %348 = vst [vmem:[#allocation5 + $0x50] sm:$0xff] %v332_v1  ;;  %349 = vst [vmem:[#allocation5 + $0x58] sm:$0xff] %v333_v15 }
 0x2fd   :  { %v321_v20 = vpop.permute.xlu1 %320 }
 0x2fe   :  { %v336_v21 = vmul.f32 %v321_v20, %v540_v18  ;;  %v337_v12 = vmul.f32 %v321_v20, %v542_v19 }
 0x300   :  { %352 = vst [vmem:[#allocation5 + $0x70] sm:$0xff] %v336_v21  ;;  %353 = vst [vmem:[#allocation5 + $0x78] sm:$0xff] %v337_v12 }
 0x301   :  { %447 = shalt.err (!%p444_p12)
}
 0x302   :  { %s448_s11 = scalar_lea.hbm %s601_s3, 2048 }
 0x303   :  { %p449_p13 = scmp.ne.s32.totalorder %s601_s3, %s448_s11  ;;  %p452_p0 = scmp.lt.u32.totalorder %s448_s11, %s601_s3 }
 0x305   :  { %p454_p1 = pnand %p452_p0, %p449_p13 }
 0x307   :  { %457 = shalt.err (!%p454_p1)
}
 0x308   :  { %365 = dma.vmem_to_hbm [thread:$0]  %s360_s7, 2048, %s601_s3, [#allocation4], %s463_s22, %s463_s22, %s464_s23  }
 0x309   :  { %460 = dma.done.wait [#allocation4], 2048  }
 0x30a   :  { %461 = vsyncadd [#allocation4], 4294965248 }
 0x30b   :  { %369 = vsyncpa [#allocation3], 1 }
 0x30c   :  { %370 = vsyncpa [#allocation4], 1 }

</bundles_post_ra>
